<compile_context>
chip_gen: v5e
topology: v5e:2x2
jax: 0.10.0
libtpu: 0.0.40
codegen_flags: <defaults>
</compile_context>

<pallas_src>
import math
import functools

import jax
import jax.numpy as jnp
from jax.experimental import pallas as pl
from jax.experimental.pallas import tpu as pltpu


def _mhsa_kernel(q_ref, kv_ref, o_ref, m_sc, l_sc, acc_sc, *, scale):
    ki = pl.program_id(2)

    @pl.when(ki == 0)
    def _():
        m_sc[...] = jnp.full_like(m_sc, -jnp.inf)
        l_sc[...] = jnp.zeros_like(l_sc)
        acc_sc[...] = jnp.zeros_like(acc_sc)

    # (G, TQ, D): fold the 1/sqrt(D) scale into the small Q tile (fewer VPU
    # multiplies than scaling the (G, TQ, TK) score matrix).
    q = q_ref[...] * jnp.asarray(scale, dtype=q_ref.dtype)
    kv = kv_ref[...]  # (G, TK, D) -- single deduped stream, used as both K and V

    # Batched QK^T contracting on D; no explicit transpose of the K tile.
    s = jnp.einsum("gqd,gkd->gqk", q, kv,
                   preferred_element_type=jnp.float32)        # (G, TQ, TK)

    m_prev = m_sc[...]                                         # (G, TQ, 1)
    m_new = jnp.maximum(m_prev, s.max(axis=-1, keepdims=True))
    alpha = jnp.exp(m_prev - m_new)                            # rescale factor
    p = jnp.exp(s - m_new)                                     # (G, TQ, TK)

    l_sc[...] = alpha * l_sc[...] + p.sum(axis=-1, keepdims=True)
    acc_sc[...] = alpha * acc_sc[...] + jnp.einsum(
        "gqk,gkd->gqd", p.astype(kv.dtype), kv,
        preferred_element_type=jnp.float32)                    # (G, TQ, D)
    m_sc[...] = m_new

    @pl.when(ki == pl.num_programs(2) - 1)
    def _():
        l = l_sc[...]
        inv = pl.reciprocal(l, approx=True)   # EUP slot (cheap)
        inv = inv * (2.0 - l * inv)           # one Newton step -> full f32 precision
        o_ref[...] = (acc_sc[...] * inv).astype(o_ref.dtype)


def xformers_mhsa(x, *, tq=128, tk=128):
    """Memory-efficient self-attention: x is [B, S, H, D], returns [B, S, H, D]."""
    B, S, H, D = x.shape
    scale = 1.0 / math.sqrt(D)

    tq = min(tq, S)
    tk = min(tk, S)
    # TODO(synk): pad + mask ragged sequence lengths instead of requiring divisibility.
    assert S % tq == 0 and S % tk == 0, (
        f"S={S} must be divisible by tile sizes tq={tq}, tk={tk}")

    # Pack G heads per block so small head dims still fill the 128-wide lanes of
    # the score/softmax path and grid steps are G-x fewer.
    G = max(1, 128 // D) if D < 128 else 1
    G = math.gcd(G, B * H)

    # [B, S, H, D] -> [B*H, S, D] (head-major).
    # TODO(synk): fold this transpose into BlockSpec index_maps once a head-minor
    # block layout avoids (8,128) padding blowup for small (H, D).
    xh = jnp.transpose(x, (0, 2, 1, 3)).reshape(B * H, S, D)

    grid = (B * H // G, S // tq, S // tk)
    kernel = functools.partial(_mhsa_kernel, scale=scale)

    out = pl.pallas_call(
        kernel,
        out_shape=jax.ShapeDtypeStruct((B * H, S, D), x.dtype),
        grid_spec=pltpu.PrefetchScalarGridSpec(
            num_scalar_prefetch=0,
            grid=grid,
            in_specs=[
                pl.BlockSpec((G, tq, D), lambda g, qi, ki: (g, qi, 0)),  # Q
                pl.BlockSpec((G, tk, D), lambda g, qi, ki: (g, ki, 0)),  # K == V
            ],
            out_specs=pl.BlockSpec((G, tq, D), lambda g, qi, ki: (g, qi, 0)),
            scratch_shapes=[
                pltpu.VMEM((G, tq, 1), jnp.float32),   # running max m
                pltpu.VMEM((G, tq, 1), jnp.float32),   # running denom l
                pltpu.VMEM((G, tq, D), jnp.float32),   # output accumulator (f32)
            ],
        ),
        compiler_params=pltpu.CompilerParams(
            dimension_semantics=("parallel", "parallel", "arbitrary")
        ),
    )(xh, xh)

    # [B*H, S, D] -> [B, S, H, D]
    return jnp.transpose(out.reshape(B, H, S, D), (0, 2, 1, 3))


def _reference_mhsa(x):
    B, S, H, D = x.shape
    q = jnp.transpose(x, (0, 2, 1, 3)).astype(jnp.float32)  # [B, H, S, D]
    s = jnp.einsum("bhqd,bhkd->bhqk", q, q) / math.sqrt(D)
    p = jax.nn.softmax(s, axis=-1)
    o = jnp.einsum("bhqk,bhkd->bhqd", p, q)
    return jnp.transpose(o, (0, 2, 1, 3)).astype(x.dtype)


if __name__ == "__main__":
    # Small shapes consistent with the module: batch=2, seq=16, heads=4, head_dim=32.
    B, S, H, D = 2, 16, 4, 32
    key = jax.random.PRNGKey(0)
    x = jax.random.normal(key, (B, S, H, D), dtype=jnp.float32)

    out = xformers_mhsa(x)
    out = jax.block_until_ready(out)

    ref = _reference_mhsa(x)
    assert out.shape == (B, S, H, D)
    assert jnp.allclose(out, ref, atol=1e-4, rtol=1e-4), "mismatch vs reference"

    print("KERNEL_OK")
</pallas_src>

<mosaic_0001>
module attributes {stable_mosaic.version = 11 : i64} {
  func.func @_mhsa_kernel(%arg0: i32, %arg1: i32, %arg2: i32, %arg3: memref<4x16x32xf32, #tpu.memory_space<vmem>>, %arg4: memref<4x16x32xf32, #tpu.memory_space<vmem>>, %arg5: memref<4x16x32xf32, #tpu.memory_space<vmem>>, %arg6: memref<4x16x1xf32, #tpu.memory_space<vmem>>, %arg7: memref<4x16x1xf32, #tpu.memory_space<vmem>>, %arg8: memref<4x16x32xf32, #tpu.memory_space<vmem>>) attributes {dimension_semantics = [#tpu.dimension_semantics<parallel>, #tpu.dimension_semantics<parallel>, #tpu.dimension_semantics<arbitrary>], iteration_bounds = array<i64: 2, 1, 1>, scalar_prefetch = 0 : i64, scratch_operands = 3 : i64, tpu.core_type = #tpu.core_type<tc>, window_params = [{transform_indices = @transform_0, window_bounds = array<i64: 4, 16, 32>}, {transform_indices = @transform_1, window_bounds = array<i64: 4, 16, 32>}, {transform_indices = @transform_2, window_bounds = array<i64: 4, 16, 32>}]} {
    %c0_i32 = arith.constant 0 : i32
    %0 = arith.cmpi eq, %arg2, %c0_i32 : i32
    %1 = arith.extui %0 : i1 to i32
    %c0_i32_0 = arith.constant 0 : i32
    %2 = arith.cmpi ne, %1, %c0_i32_0 : i32
    scf.if %2 {
      %cst_30 = arith.constant 0xFF800000 : f32
      %33 = vector.broadcast %cst_30 : f32 to vector<4x16x1xf32>
      %c0_31 = arith.constant 0 : index
      %c0_32 = arith.constant 0 : index
      %c0_33 = arith.constant 0 : index
      %34 = vector.load %arg6[%c0_31, %c0_32, %c0_33] : memref<4x16x1xf32, #tpu.memory_space<vmem>>, vector<4x16x1xf32>
      tpu.vector_store %arg6[%c0_31, %c0_32, %c0_33], %33 {strides = array<i32>} : memref<4x16x1xf32, #tpu.memory_space<vmem>>, vector<4x16x1xf32>,
      %cst_34 = arith.constant 0.000000e+00 : f32
      %35 = vector.broadcast %cst_34 : f32 to vector<4x16x1xf32>
      %c0_35 = arith.constant 0 : index
      %c0_36 = arith.constant 0 : index
      %c0_37 = arith.constant 0 : index
      %36 = vector.load %arg7[%c0_35, %c0_36, %c0_37] : memref<4x16x1xf32, #tpu.memory_space<vmem>>, vector<4x16x1xf32>
      tpu.vector_store %arg7[%c0_35, %c0_36, %c0_37], %35 {strides = array<i32>} : memref<4x16x1xf32, #tpu.memory_space<vmem>>, vector<4x16x1xf32>,
      %cst_38 = arith.constant 0.000000e+00 : f32
      %37 = vector.broadcast %cst_38 : f32 to vector<4x16x32xf32>
      %c0_39 = arith.constant 0 : index
      %c0_40 = arith.constant 0 : index
      %c0_41 = arith.constant 0 : index
      %38 = vector.load %arg8[%c0_39, %c0_40, %c0_41] : memref<4x16x32xf32, #tpu.memory_space<vmem>>, vector<4x16x32xf32>
      tpu.vector_store %arg8[%c0_39, %c0_40, %c0_41], %37 {strides = array<i32>} : memref<4x16x32xf32, #tpu.memory_space<vmem>>, vector<4x16x32xf32>,
    } else {
    }
    %c0 = arith.constant 0 : index
    %c0_1 = arith.constant 0 : index
    %c0_2 = arith.constant 0 : index
    %3 = vector.load %arg3[%c0, %c0_1, %c0_2] : memref<4x16x32xf32, #tpu.memory_space<vmem>>, vector<4x16x32xf32>
    %cst = arith.constant 0.176776692 : f32
    %4 = vector.broadcast %cst : f32 to vector<4x16x32xf32>
    %5 = arith.mulf %3, %4 : vector<4x16x32xf32>
    %c0_3 = arith.constant 0 : index
    %c0_4 = arith.constant 0 : index
    %c0_5 = arith.constant 0 : index
    %6 = vector.load %arg4[%c0_3, %c0_4, %c0_5] : memref<4x16x32xf32, #tpu.memory_space<vmem>>, vector<4x16x32xf32>
    "tpu.trace_start"() <{level = 10 : i32, message = "gqd,gkd->gqk"}> : () -> ()
    %cst_6 = arith.constant dense<0.000000e+00> : vector<4x16x16xf32>
    %7 = tpu.matmul %5, %6, %cst_6 {dimension_numbers = #tpu.dot_dimension_numbers<[2], [2], [1], [1], [0, 0, 0, 1, 1, 1], [0], [0]>} : vector<4x16x32xf32>, vector<4x16x32xf32>, vector<4x16x16xf32> -> vector<4x16x16xf32>
    "tpu.trace_stop"() : () -> ()
    %c0_7 = arith.constant 0 : index
    %c0_8 = arith.constant 0 : index
    %c0_9 = arith.constant 0 : index
    %8 = vector.load %arg6[%c0_7, %c0_8, %c0_9] : memref<4x16x1xf32, #tpu.memory_space<vmem>>, vector<4x16x1xf32>
    %cst_10 = arith.constant dense<0xFF800000> : vector<4x16xf32>
    %9 = vector.multi_reduction <maximumf>, %7, %cst_10 [2] : vector<4x16x16xf32> to vector<4x16xf32>
    %10 = vector.shape_cast %9 : vector<4x16xf32> to vector<4x16x1xf32>
    %11 = arith.maximumf %8, %10 : vector<4x16x1xf32>
    %12 = arith.subf %8, %11 : vector<4x16x1xf32>
    %13 = math.exp %12 : vector<4x16x1xf32>
    %14 = vector.broadcast %11 : vector<4x16x1xf32> to vector<4x16x16xf32>
    %15 = arith.subf %7, %14 : vector<4x16x16xf32>
    %16 = math.exp %15 : vector<4x16x16xf32>
    %c0_11 = arith.constant 0 : index
    %c0_12 = arith.constant 0 : index
    %c0_13 = arith.constant 0 : index
    %17 = vector.load %arg7[%c0_11, %c0_12, %c0_13] : memref<4x16x1xf32, #tpu.memory_space<vmem>>, vector<4x16x1xf32>
    %18 = arith.mulf %13, %17 : vector<4x16x1xf32>
    %cst_14 = arith.constant dense<0.000000e+00> : vector<4x16xf32>
    %19 = vector.multi_reduction <add>, %16, %cst_14 [2] : vector<4x16x16xf32> to vector<4x16xf32>
    %20 = vector.shape_cast %19 : vector<4x16xf32> to vector<4x16x1xf32>
    %21 = arith.addf %18, %20 : vector<4x16x1xf32>
    %c0_15 = arith.constant 0 : index
    %c0_16 = arith.constant 0 : index
    %c0_17 = arith.constant 0 : index
    %22 = vector.load %arg7[%c0_15, %c0_16, %c0_17] : memref<4x16x1xf32, #tpu.memory_space<vmem>>, vector<4x16x1xf32>
    tpu.vector_store %arg7[%c0_15, %c0_16, %c0_17], %21 {strides = array<i32>} : memref<4x16x1xf32, #tpu.memory_space<vmem>>, vector<4x16x1xf32>,
    %c0_18 = arith.constant 0 : index
    %c0_19 = arith.constant 0 : index
    %c0_20 = arith.constant 0 : index
    %23 = vector.load %arg8[%c0_18, %c0_19, %c0_20] : memref<4x16x32xf32, #tpu.memory_space<vmem>>, vector<4x16x32xf32>
    %24 = vector.broadcast %13 : vector<4x16x1xf32> to vector<4x16x32xf32>
    %25 = arith.mulf %24, %23 : vector<4x16x32xf32>
    "tpu.trace_start"() <{level = 10 : i32, message = "gqk,gkd->gqd"}> : () -> ()
    %cst_21 = arith.constant dense<0.000000e+00> : vector<4x16x32xf32>
    %26 = tpu.matmul %16, %6, %cst_21 {dimension_numbers = #tpu.dot_dimension_numbers<[2], [1], [1], [2], [0, 0, 0, 1, 1, 2], [0], [0]>} : vector<4x16x16xf32>, vector<4x16x32xf32>, vector<4x16x32xf32> -> vector<4x16x32xf32>
    "tpu.trace_stop"() : () -> ()
    %27 = arith.addf %25, %26 : vector<4x16x32xf32>
    %c0_22 = arith.constant 0 : index
    %c0_23 = arith.constant 0 : index
    %c0_24 = arith.constant 0 : index
    %28 = vector.load %arg8[%c0_22, %c0_23, %c0_24] : memref<4x16x32xf32, #tpu.memory_space<vmem>>, vector<4x16x32xf32>
    tpu.vector_store %arg8[%c0_22, %c0_23, %c0_24], %27 {strides = array<i32>} : memref<4x16x32xf32, #tpu.memory_space<vmem>>, vector<4x16x32xf32>,
    %c0_25 = arith.constant 0 : index
    %c0_26 = arith.constant 0 : index
    %c0_27 = arith.constant 0 : index
    %29 = vector.load %arg6[%c0_25, %c0_26, %c0_27] : memref<4x16x1xf32, #tpu.memory_space<vmem>>, vector<4x16x1xf32>
    tpu.vector_store %arg6[%c0_25, %c0_26, %c0_27], %11 {strides = array<i32>} : memref<4x16x1xf32, #tpu.memory_space<vmem>>, vector<4x16x1xf32>,
    %c0_i32_28 = arith.constant 0 : i32
    %30 = arith.cmpi eq, %arg2, %c0_i32_28 : i32
    %31 = arith.extui %30 : i1 to i32
    %c0_i32_29 = arith.constant 0 : i32
    %32 = arith.cmpi ne, %31, %c0_i32_29 : i32
    scf.if %32 {
      %c0_30 = arith.constant 0 : index
      %c0_31 = arith.constant 0 : index
      %c0_32 = arith.constant 0 : index
      %33 = vector.load %arg7[%c0_30, %c0_31, %c0_32] : memref<4x16x1xf32, #tpu.memory_space<vmem>>, vector<4x16x1xf32>
      %34 = tpu.reciprocal %33 {approx = true} : vector<4x16x1xf32> -> vector<4x16x1xf32>
      %35 = arith.mulf %33, %34 : vector<4x16x1xf32>
      %cst_33 = arith.constant 2.000000e+00 : f32
      %36 = vector.broadcast %cst_33 : f32 to vector<4x16x1xf32>
      %37 = arith.subf %36, %35 : vector<4x16x1xf32>
      %38 = arith.mulf %34, %37 : vector<4x16x1xf32>
      %c0_34 = arith.constant 0 : index
      %c0_35 = arith.constant 0 : index
      %c0_36 = arith.constant 0 : index
      %39 = vector.load %arg8[%c0_34, %c0_35, %c0_36] : memref<4x16x32xf32, #tpu.memory_space<vmem>>, vector<4x16x32xf32>
      %40 = vector.broadcast %38 : vector<4x16x1xf32> to vector<4x16x32xf32>
      %41 = arith.mulf %39, %40 : vector<4x16x32xf32>
      %c0_37 = arith.constant 0 : index
      %c0_38 = arith.constant 0 : index
      %c0_39 = arith.constant 0 : index
      %42 = vector.load %arg5[%c0_37, %c0_38, %c0_39] : memref<4x16x32xf32, #tpu.memory_space<vmem>>, vector<4x16x32xf32>
      tpu.vector_store %arg5[%c0_37, %c0_38, %c0_39], %41 {strides = array<i32>} : memref<4x16x32xf32, #tpu.memory_space<vmem>>, vector<4x16x32xf32>,
    } else {
    }
    return
  }
  func.func @transform_0(%arg0: i32, %arg1: i32, %arg2: i32) -> (i32, i32, i32) {
    %c0_i32 = arith.constant 0 : i32
    %c0_i32_0 = arith.constant 0 : i32
    return %arg0, %arg1, %c0_i32 : i32, i32, i32
  }
  func.func @transform_1(%arg0: i32, %arg1: i32, %arg2: i32) -> (i32, i32, i32) {
    %c0_i32 = arith.constant 0 : i32
    %c0_i32_0 = arith.constant 0 : i32
    return %arg0, %arg2, %c0_i32 : i32, i32, i32
  }
  func.func @transform_2(%arg0: i32, %arg1: i32, %arg2: i32) -> (i32, i32, i32) {
    %c0_i32 = arith.constant 0 : i32
    %c0_i32_0 = arith.constant 0 : i32
    return %arg0, %arg1, %c0_i32 : i32, i32, i32
  }
}

</mosaic_0001>

<bundles_post_ra>
// kernel: tpu_custom_call.1
= control target key start
LH: loop header
LB: loop body
LE: loop exit
PB: predicated region body
PF: predicated region fallthrough
CT: control target
= control target key end

     0   :  { %7 = vsyncpa [#allocation6], 0  ;;  %s1779_s0 = inlined_call_operand.hbm [shape: f32[8,16,32], index: 0, kind: input, shape index: {}]   ;;  %s1780_s1 = inlined_call_operand.hbm [shape: f32[8,16,32], index: 1, kind: input, shape index: {}]   ;;  %s1781_s2 = inlined_call_operand.hbm [shape: f32[8,16,32], index: 2, kind: output, shape index: {}]  }
   0x1   :  { %9 = vsyncpa [#allocation6 + $0x1], 0 }
   0x2   :  { %10 = vsyncpa [#allocation9], 0 }
   0x3   :  { %12 = vsyncpa [#allocation9 + $0x1], 0 }
   0x4   :  { %13 = vsyncpa [#allocation7], 0 }
   0x5   :  { %15 = vsyncpa [#allocation7 + $0x1], 0  ;;  %s1409_s9 = smov 0   ;;  %s1411_s10 = smov 0  }
   0x6   :  { %s1413_s11 = smov 0   ;;  %s1415_s12 = smov 0  }
   0x7   :  { %s1417_s13 = smov 0   ;;  %s1419_s14 = smov 0  }
   0x8 LB: > { %s1062_s15 = sadd.s32 4294967295, %s1385_s14   ;;  %s1063_s16 = sadd.s32 4294967294, %s1385_s14   ;;  %s1385_s14 = sphi %s1419_s14, %s21_s14   ;;  %s1381_s13 = sphi %s1417_s13, %s1791_s13   ;;  %s1377_s12 = sphi %s1415_s12, %s1790_s12   ;;  %s1373_s11 = sphi %s1413_s11, %s1789_s11   ;;  %s1369_s10 = sphi %s1411_s10, %s1788_s10   ;;  %s1365_s9 = sphi %s1409_s9, %s1787_s9  }
   0x9   : > { %s40_s17 = sadd.s32 1, %s1381_s13  ;;  %s49_s18 = sadd.s32 1, %s1373_s11 }
   0xa   : > { %p42_p0 = scmp.ge.s32.totalorder %s40_s17, 2  ;;  %p56_p1 = scmp.ne.s32.totalorder %s1373_s11, %s1369_s10 }
   0xb   : > { %p57_p2 = scmp.eq.s32.totalorder %s1385_s14, 0  ;;  %p62_p3 = scmp.ne.s32.totalorder %s1369_s10, %s1365_s9 }
   0xc   : > { %s1793_s17 = smov (%p42_p0, %s40_s17), 0  ;;  %p63_p5 = scmp.eq.s32.totalorder %s1062_s15, 0 }
   0xd   : > { %p1450_p4 = por %p57_p2, %p56_p1  ;;  %s44_s20 = ssub.s32 %s1381_s13, %s1793_s17 }
   0xe   : > { %p116_p6 = scmp.eq.s32.totalorder %s1062_s15, 1  ;;  %p47_p7 = scmp.eq.s32.totalorder %s44_s20, 0 }
   0xf   : > { %p1456_p8 = por %p63_p5, %p62_p3  ;;  %p122_p10 = scmp.eq.s32.totalorder %s1063_s16, 1 }
  0x10   : > { %p1460_p9 = por %p116_p6, %p56_p1  ;;  %p1065_p12 = scmp.ge.s32.totalorder %s1385_s14, 2 }
  0x11   : > { %s1465_s23 = scalar_select %p47_p7, %s1373_s11, %s49_s18  }
  0x12   : > { %p1467_p11 = por %p122_p10, %p62_p3  ;;  %p1131_p13 = scmp.lt.s32.totalorder %s1385_s14, 2 }
  0x13   : > { %s1474_s25 = sand.u32 1, %s1373_s11   ;;  %s1109_s27 = sshll.u32 %s1381_s13, 6 }
  0x14   : > { %s1066_s26 = sshll.u32 %s1474_s25, 6  ;;  %s154_s30 = scalar_lea.hbm %s1779_s0, %s1109_s27 }
  0x15   : > { %s146_s3 = scalar_lea.vmem [#allocation5], %s1066_s26  ;;  %s155_s5 = sshll.u32 %s154_s30, 4  ;;  %s156_s5 = int_to_ptr.hbm [resolvable:$true] %s155_s5 }
  0x16   : > { %s157_s4 = sshll.u32 %s146_s3, 4  ;;  %p1483_p0 = pnand %p1131_p13, %p1450_p4  ;;  %s158_s4 = int_to_ptr.vmem [resolvable:$true] %s157_s4 }
  0x17   : > { %p1074_p1 = scmp.ge.s32.totalorder %s1385_s14, 1  ;;  %s143_s7 = scalar_lea.sflag [#allocation6], %s1474_s25 }
  0x18   : > { %s1387_s8 = smov 128   ;;  %s1388_s15 = smov 8  }
  0x19   : > { %1123 = dma.hbm_to_vmem [thread:$0]  (!%p1483_p0), %s156_s5, 1024, %s158_s4, %s143_s7, %s1387_s8, %s1387_s8, %s1388_s15  }
  0x1a   : > { %p190_p2 = scmp.lt.s32.totalorder %s1385_s14, 3  ;;  %s179_s20 = scalar_lea.hbm %s1780_s1, %s1109_s27 }
  0x1b   : > { %s180_s28 = sshll.u32 %s179_s20, 4  ;;  %s171_s19 = scalar_lea.vmem [#allocation8], %s1066_s26  ;;  %s181_s28 = int_to_ptr.hbm [resolvable:$true] %s180_s28 }
  0x1c   : > { %p191_p3 = pnand %p1074_p1, %p190_p2  ;;  %s182_s29 = sshll.u32 %s171_s19, 4  ;;  %s183_s29 = int_to_ptr.vmem [resolvable:$true] %s182_s29 }
  0x1d   : > { %s168_s30 = scalar_lea.sflag [#allocation9], %s1474_s25  ;;  %s1499_s3 = sand.u32 (!%p191_p3), 1, %s1369_s10  }
  0x1e   : > { %1126 = dma.hbm_to_vmem [thread:$0]  (!%p1483_p0), %s181_s28, 1024, %s183_s29, %s168_s30, %s1387_s8, %s1387_s8, %s1388_s15  }
  0x1f   : > { %194 = sbr.rel (%p191_p3) target bundleno = 710 (0x2c6), region = 28  ;;  %s1502_s4 = sshll.u32 (!%p191_p3), %s1499_s3, 6 }
  0x20   : > { %s197_s27 = scalar_lea.sflag (!%p191_p3), [#allocation6], %s1499_s3  ;;  %s1506_s5 = scalar_lea.vmem (!%p191_p3), [#allocation5], %s1502_s4 }
  0x24   : > { %1352 = dma.done.wait (%p1456_p8), %s197_s27, 1024  }
  0x25   : > { %1354 = vsyncadd (%p1456_p8), %s197_s27, 4294966272  ;;  %s207_s25 = scalar_lea.sflag [#allocation9], %s1499_s3  ;;  %s210_s26 = scalar_lea.vmem [#allocation8], %s1502_s4 }
  0x26   : > { %1356 = dma.done.wait (%p1456_p8), %s207_s25, 1024  }
  0x27   : > { %1358 = vsyncadd (%p1456_p8), %s207_s25, 4294966272  ;;  %vm264_vm0 = vcmask 261120   ;;  %v290_v0 = vld [vmem:[%s210_s26 + $0x8] sm:$0xff]  ;;  %v289_v2 = vld [vmem:[%s210_s26] sm:$0xff]  ;;  %vm247_vm1 = vcmask 7168   ;;  %v1389_v24 = vmov -inf  }
  0x28   : > { %v294_v1 = vld [vmem:[%s210_s26 + $0x28] sm:$0xff]  ;;  %1078 = vmatpush.xpose.msk.msra.mxu0 %vm264_vm0, %v290_v0  ;;  %v273_v3 = vld [vmem:[%s1506_s5] sm:$0xff]  ;;  %v296_v6 = vld [vmem:[%s210_s26 + $0x38] sm:$0xff]  ;;  %248 = vst.msk [vmem:[#allocation2] sm:$0xff] %vm247_vm1, %v1389_v24  ;;  %vm446_vm2 = vcmask 130048   ;;  %v1390_v41 = vmov 0  }
  0x29   : > { %1086 = vmatpush.xpose.msk.msra.mxu2 %vm264_vm0, %v294_v1  ;;  %v277_v4 = vld [vmem:[%s1506_s5 + $0x20] sm:$0xff]  ;;  %v292_v7 = vld [vmem:[%s210_s26 + $0x18] sm:$0xff]  ;;  %v281_v8 = vmul.f32 0.17677669, %v273_v3  ;;  %1090 = vmatpush.xpose.msk.msra.mxu3 %vm264_vm0, %v296_v6  ;;  %v295_v9 = vld [vmem:[%s210_s26 + $0x30] sm:$0xff]  ;;  %249 = vst.msk [vmem:[#allocation2 + $0x8] sm:$0xff] %vm247_vm1, %v1389_v24 }
  0x2a   : > { %v293_v5 = vld [vmem:[%s210_s26 + $0x20] sm:$0xff]  ;;  %1082 = vmatpush.xpose.msk.msra.mxu1 %vm264_vm0, %v292_v7  ;;  %v285_v10 = vmul.f32 0.17677669, %v277_v4  ;;  %v291_v11 = vld [vmem:[%s210_s26 + $0x10] sm:$0xff]  ;;  %v278_v16 = vld [vmem:[%s1506_s5 + $0x28] sm:$0xff]  ;;  %250 = vst.msk [vmem:[#allocation2 + $0x10] sm:$0xff] %vm247_vm1, %v1389_v24  ;;  %1190 = vset.pattern.permute.xlu1 %v1390_v41 }
  0x2b   : > { %v279_v12 = vld [vmem:[%s1506_s5 + $0x30] sm:$0xff]  ;;  %v274_v17 = vld [vmem:[%s1506_s5 + $0x8] sm:$0xff]  ;;  %v280_v18 = vld [vmem:[%s1506_s5 + $0x38] sm:$0xff]  ;;  %v286_v20 = vmul.f32 0.17677669, %v278_v16  ;;  %251 = vst.msk [vmem:[#allocation2 + $0x18] sm:$0xff] %vm247_vm1, %v1389_v24  ;;  %1188 = vset.pattern.permute.xlu2 %v1390_v41  ;;  %1189 = vset.pattern.permute.xlu0 %v1390_v41 }
  0x2c   : > { %v275_v13 = vld [vmem:[%s1506_s5 + $0x10] sm:$0xff]  ;;  %1079 = vmatpush.xpose.msk.msra.mxu0 %vm264_vm0, %v289_v2  ;;  %v287_v14 = vmul.f32 0.17677669, %v279_v12  ;;  %v276_v19 = vld [vmem:[%s1506_s5 + $0x18] sm:$0xff]  ;;  %v282_v21 = vmul.f32 0.17677669, %v274_v17 }
  0x2d   : > { %1087 = vmatpush.xpose.msk.msra.mxu2 %vm264_vm0, %v293_v5  ;;  %v283_v15 = vmul.f32 0.17677669, %v275_v13  ;;  %1091 = vmatpush.xpose.msk.msra.mxu3 %vm264_vm0, %v295_v9  ;;  %v288_v22 = vmul.f32 0.17677669, %v280_v18  ;;  %v284_v23 = vmul.f32 0.17677669, %v276_v19 }
  0x2e   : > { %1083 = vmatpush.xpose.msk.msra.mxu1 %vm264_vm0, %v291_v11  ;;  %252 = vst.msk [vmem:[#allocation2 + $0x20] sm:$0xff] %vm247_vm1, %v1389_v24  ;;  %v1391_v42 = vmov 0.0   ;;  %s1722_s21 = scalar_lea.vmem [#allocation10], %s1502_s4  ;;  %s1113_s6 = sshll.u32 %s1377_s12, 6 }
  0x2f   : > { %1080 = vmatmul.msk.f32.vlgmr.msra.gmra.mxu0 %vm264_vm0, %v281_v8  ;;  %253 = vst.msk [vmem:[#allocation2 + $0x28] sm:$0xff] %vm247_vm1, %v1389_v24  ;;  %v438_v43 = vld [vmem:[#allocation2] sm:$0xff]  ;;  %s942_s15 = scalar_lea.hbm %s1781_s2, %s1113_s6  ;;  %s943_s16 = sshll.u32 %s1722_s21, 4  ;;  %s944_s16 = int_to_ptr.vmem [resolvable:$true] %s943_s16 }
  0x30   : > { %700 = vmatpush.msrb.mxu0 %v290_v0  ;;  %1088 = vmatmul.msk.f32.vlgmr.msra.gmra.mxu2 %vm264_vm0, %v285_v10  ;;  %254 = vst.msk [vmem:[#allocation2 + $0x30] sm:$0xff] %vm247_vm1, %v1389_v24  ;;  %v439_v3 = vld [vmem:[#allocation2 + $0x8] sm:$0xff]  ;;  %s945_s18 = sshll.u32 %s942_s15, 4  ;;  %s928_s12 = scalar_lea.sflag [#allocation7], %s1499_s3  ;;  %s946_s18 = int_to_ptr.hbm [resolvable:$true] %s945_s18 }
  0x31   : > { %758 = vmatpush.msrb.mxu2 %v294_v1  ;;  %1092 = vmatmul.msk.f32.vlgmr.msra.gmra.mxu3 %vm264_vm0, %v287_v14  ;;  %255 = vst.msk [vmem:[#allocation2 + $0x38] sm:$0xff] %vm247_vm1, %v1389_v24  ;;  %v440_v48 = vld [vmem:[#allocation2 + $0x10] sm:$0xff]  ;;  %s1313_s20 = sshra.s32 %s946_s18, 4  ;;  %s1319_s30 = scalar_lea.hbm %s1781_s2, 128  ;;  %s1314_s20 = int_to_ptr.hbm [resolvable:$true] %s1313_s20 }
  0x32   : > { %729 = vmatpush.msrb.mxu1 %v292_v7  ;;  %701 = vmatpush.msrb.mxu0 %v289_v2  ;;  %266 = vst.msk [vmem:[#allocation4 + $0x8] sm:$0xff] %vm264_vm0, %v1391_v42  ;;  %v441_v59 = vld [vmem:[#allocation2 + $0x18] sm:$0xff]  ;;  %s1315_s28 = scalar_lea.hbm %s1314_s20, 64  ;;  %p1320_p7 = scmp.lt.s32.totalorder %s1314_s20, %s1781_s2 }
  0x33   : > { %759 = vmatpush.msrb.mxu2 %v293_v5  ;;  %1084 = vmatmul.msk.f32.vlgmr.msra.gmra.mxu1 %vm264_vm0, %v283_v15  ;;  %256 = vst.msk [vmem:[#allocation3] sm:$0xff] %vm247_vm1, %v1391_v42  ;;  %p1316_p4 = scmp.ne.s32.totalorder %s1314_s20, %s1315_s28  ;;  %p1321_p8 = scmp.lt.s32.totalorder %s1319_s30, %s1315_s28 }
  0x34   : > { %730 = vmatpush.msrb.mxu1 %v291_v11  ;;  %787 = vmatpush.msrb.mxu3 %v296_v6  ;;  %257 = vst.msk [vmem:[#allocation3 + $0x8] sm:$0xff] %vm247_vm1, %v1391_v42 }
  0x35   : > { %258 = vst.msk [vmem:[#allocation3 + $0x10] sm:$0xff] %vm247_vm1, %v1391_v42  ;;  %v1599_v46 = vld [vmem:[#allocation2 + $0x20] sm:$0xff]  ;;  %p1317_p5 = pnand %p1316_p4, %p1460_p9  ;;  %p1322_p10 = por %p1321_p8, %p1320_p7 }
  0x36   : > { %788 = vmatpush.msrb.mxu3 %v295_v9  ;;  %259 = vst.msk [vmem:[#allocation3 + $0x18] sm:$0xff] %vm247_vm1, %v1391_v42  ;;  %v1612_v55 = vld [vmem:[#allocation2 + $0x28] sm:$0xff] }
  0x37   : > { %1081 = vmatmul.msk.f32.gmra.mxu0 %vm264_vm0, %v282_v21  ;;  %260 = vst.msk [vmem:[#allocation3 + $0x20] sm:$0xff] %vm247_vm1, %v1391_v42  ;;  %v1610_v54 = vld [vmem:[#allocation2 + $0x30] sm:$0xff]  ;;  %p1318_p6 = pneg %p1317_p5 }
  0x38   : > { %1089 = vmatmul.msk.f32.gmra.mxu2 %vm264_vm0, %v286_v20  ;;  %261 = vst.msk [vmem:[#allocation3 + $0x28] sm:$0xff] %vm247_vm1, %v1391_v42  ;;  %v1630_v2 = vld [vmem:[#allocation2 + $0x38] sm:$0xff] }
  0x39   : > { %1093 = vmatmul.msk.f32.gmra.mxu3 %vm264_vm0, %v288_v22  ;;  %262 = vst.msk [vmem:[#allocation3 + $0x30] sm:$0xff] %vm247_vm1, %v1391_v42  ;;  %p1323_p13 = pnand %p1322_p10, %p1318_p6 }
  0x3a   : > { %263 = vst.msk [vmem:[#allocation3 + $0x38] sm:$0xff] %vm247_vm1, %v1391_v42 }
  0x3b   : > { %1085 = vmatmul.msk.f32.gmra.mxu1 %vm264_vm0, %v284_v23  ;;  %265 = vst.msk [vmem:[#allocation4] sm:$0xff] %vm264_vm0, %v1391_v42 }
  0x3c   : > { %267 = vst.msk [vmem:[#allocation4 + $0x10] sm:$0xff] %vm264_vm0, %v1391_v42 }
  0x3d   : > { %268 = vst.msk [vmem:[#allocation4 + $0x18] sm:$0xff] %vm264_vm0, %v1391_v42 }
  0x3e   : > { %269 = vst.msk [vmem:[#allocation4 + $0x20] sm:$0xff] %vm264_vm0, %v1391_v42 }
  0x3f   : > { %270 = vst.msk [vmem:[#allocation4 + $0x28] sm:$0xff] %vm264_vm0, %v1391_v42 }
  0x40   : > { %271 = vst.msk [vmem:[#allocation4 + $0x30] sm:$0xff] %vm264_vm0, %v1391_v42 }
  0x41   : > { %272 = vst.msk [vmem:[#allocation4 + $0x38] sm:$0xff] %vm264_vm0, %v1391_v42 }
  0xac   : > { %v1549_v25 = vpop.f32.mrf.mxu0 }
  0xad   : > { %v447_v26 = vsel %vm446_vm2, %v1549_v25, -inf }
  0xae   : > { %448 = vmax.xlane.f32.xlu1 %v447_v26 }
  0xb0   : > { %v1554_v27 = vpop.f32.mrf.mxu1 }
  0xb1   : > { %v453_v30 = vsel %vm446_vm2, %v1554_v27, -inf }
  0xb3   : > { %v1556_v28 = vpop.f32.mrf.mxu2 }
  0xb4   : > { %v459_v29 = vsel %vm446_vm2, %v1556_v28, -inf  ;;  %v1562_v31 = vpop.f32.mrf.mxu3  ;;  %v1576_v38 = vpop.f32.mrf.mxu0 }
  0xb5   : > { %460 = vmax.xlane.f32.xlu0 %v459_v29  ;;  %v465_v33 = vsel %vm446_vm2, %v1562_v31, -inf  ;;  %v450_v40 = vsel %vm446_vm2, %v1576_v38, -inf }
  0xb6   : > { %454 = vmax.xlane.f32.xlu1 %v453_v30 }
  0xb8   : > { %v1564_v32 = vpop.f32.mrf.mxu1 }
  0xb9   : > { %v456_v36 = vsel %vm446_vm2, %v1564_v32, -inf }
  0xbb   : > { %v1568_v34 = vpop.f32.mrf.mxu2 }
  0xbc   : > { %v462_v35 = vsel %vm446_vm2, %v1568_v34, -inf  ;;  %v1574_v37 = vpop.f32.mrf.mxu3 }
  0xbd   : > { %466 = vmax.xlane.f32.xlu0 %v465_v33  ;;  %463 = vmax.xlane.f32.xlu2 %v462_v35  ;;  %v468_v39 = vsel %vm446_vm2, %v1574_v37, -inf }
  0xbe   : > { %457 = vmax.xlane.f32.xlu1 %v456_v36 }
  0xc5   : > { %469 = vmax.xlane.f32.xlu2 %v468_v39  ;;  %451 = vmax.xlane.f32.xlu0 %v450_v40 }
 0x121   : > { %v449_v44 = vpop.xlane.xlu1 %448 }
 0x122   : > { %v471_v45 = vmax.f32 %v438_v43, %v449_v44 }
 0x124   : > { %812 = vst.msk [vmem:[#allocation2] sm:$0xff] %vm247_vm1, %v471_v45  ;;  %505 = vperm.xlu1 %1190, %v471_v45   ;;  %v479_v11 = vsub.f32 %v438_v43, %v471_v45 }
 0x126   : > { %v487_v13 = vmul.f32 1.442695, %v479_v11 }
 0x128   : > { %v461_v47 = vpop.xlane.xlu0 %460 }
 0x129   : > { %v1602_v49 = vmax.f32 %v1599_v46, %v461_v47  ;;  %v455_v50 = vpop.xlane.xlu1 %454 }
 0x12a   : > { %v473_v52 = vmax.f32 %v440_v48, %v455_v50 }
 0x12b   : > { %v483_v51 = vsub.f32 %v1599_v46, %v1602_v49  ;;  %816 = vst.msk [vmem:[#allocation2 + $0x20] sm:$0xff] %vm247_vm1, %v1602_v49  ;;  %525 = vperm.xlu2 %1188, %v1602_v49  }
 0x12c   : > { %v481_v53 = vsub.f32 %v440_v48, %v473_v52  ;;  %814 = vst.msk [vmem:[#allocation2 + $0x10] sm:$0xff] %vm247_vm1, %v473_v52 }
 0x12e   : > { %v491_v56 = vmul.f32 1.442695, %v481_v53 }
 0x130   : > { %v467_v57 = vpop.xlane.xlu0 %466  ;;  %v464_v58 = vpop.xlane.xlu2 %463  ;;  %1191 = vpow2.f32 %v491_v56 }
 0x131   : > { %v1615_v60 = vmax.f32 %v1610_v54, %v467_v57  ;;  %v1618_v61 = vmax.f32 %v1612_v55, %v464_v58  ;;  %v458_v62 = vpop.xlane.xlu1 %457 }
 0x132   : > { %v474_v1 = vmax.f32 %v441_v59, %v458_v62 }
 0x133   : > { %v485_v63 = vsub.f32 %v1610_v54, %v1615_v60  ;;  %818 = vst.msk [vmem:[#allocation2 + $0x30] sm:$0xff] %vm247_vm1, %v1615_v60  ;;  %v484_v0 = vsub.f32 %v1612_v55, %v1618_v61  ;;  %535 = vperm.xlu0 %1189, %v1615_v60   ;;  %515 = vperm.xlu2 %1188, %v473_v52   ;;  %v572_v55 = vld [vmem:[#allocation3 + $0x28] sm:$0xff] }
 0x134   : > { %817 = vst.msk [vmem:[#allocation2 + $0x28] sm:$0xff] %vm247_vm1, %v1618_v61  ;;  %v482_v14 = vsub.f32 %v441_v59, %v474_v1 }
 0x135   : > { %815 = vst.msk [vmem:[#allocation2 + $0x18] sm:$0xff] %vm247_vm1, %v474_v1  ;;  %v499_v57 = vmul.f32 1.442695, %v485_v63  ;;  %v495_v63 = vmul.f32 1.442695, %v483_v51  ;;  %v569_v51 = vld [vmem:[#allocation3 + $0x10] sm:$0xff] }
 0x136   : > { %v1632_v4 = vpop.eup %1191  ;;  %v493_v15 = vmul.f32 1.442695, %v482_v14 }
 0x138   : > { %v470_v5 = vpop.xlane.xlu2 %469  ;;  %v452_v6 = vpop.xlane.xlu0 %451 }
 0x139   : > { %v1635_v7 = vmax.f32 %v1630_v2, %v470_v5  ;;  %v472_v8 = vmax.f32 %v439_v3, %v452_v6 }
 0x13b   : > { %v486_v9 = vsub.f32 %v1630_v2, %v1635_v7  ;;  %819 = vst.msk [vmem:[#allocation2 + $0x38] sm:$0xff] %vm247_vm1, %v1635_v7  ;;  %530 = vperm.xlu2 %1188, %v1618_v61   ;;  %644 = vperm.xlu0 %1189, %v1632_v4   ;;  %v480_v10 = vsub.f32 %v439_v3, %v472_v8  ;;  %v626_v61 = vld [vmem:[#allocation4 + $0x10] sm:$0xff] }
 0x13c   : > { %540 = vperm.xlu1 %1190, %v1635_v7   ;;  %813 = vst.msk [vmem:[#allocation2 + $0x8] sm:$0xff] %vm247_vm1, %v472_v8  ;;  %v577_v2 = vmul.f32 %v1632_v4, %v569_v51 }
 0x13d   : > { %v489_v12 = vmul.f32 1.442695, %v480_v10  ;;  %v501_v6 = vmul.f32 1.442695, %v486_v9  ;;  %v497_v10 = vmul.f32 1.442695, %v484_v0 }
 0x13e   : > { %v567_v0 = vld [vmem:[#allocation3] sm:$0xff] }
 0x13f   : > { %1193 = vpow2.f32 %v489_v12 }
 0x140   : > { %1195 = vpow2.f32 %v487_v13 }
 0x141   : > { %1197 = vpow2.f32 %v493_v15 }
 0x143   : > { %510 = vperm.xlu2 %1188, %v472_v8  }
 0x144   : > { %520 = vperm.xlu1 %1190, %v474_v1  }
 0x145   : > { %v1645_v16 = vpop.eup %1193 }
 0x146   : > { %v1647_v17 = vpop.eup %1195 }
 0x147   : > { %v1651_v18 = vpop.eup %1197 }
 0x14b   : > { %639 = vperm.xlu2 %1188, %v1645_v16  }
 0x14c   : > { %634 = vperm.xlu1 %1190, %v1647_v17  }
 0x154   : > { %649 = vperm.xlu1 %1190, %v1651_v18  }
 0x185   : > { %v526_v19 = vpop.permute.xlu2 %525 }
 0x186   : > { %v547_v20 = vsub.f32 %v1556_v28, %v526_v19 }
 0x188   : > { %v559_v21 = vmul.f32 1.442695, %v547_v20 }
 0x18a   : > { %1199 = vpow2.f32 %v559_v21 }
 0x18d   : > { %v516_v22 = vpop.permute.xlu2 %515 }
 0x18e   : > { %v545_v23 = vsub.f32 %v1554_v27, %v516_v22  ;;  %v575_v22 = vmul.f32 %v1647_v17, %v567_v0 }
 0x190   : > { %v1200_v24 = vpop.eup %1199  ;;  %v555_v26 = vmul.f32 1.442695, %v545_v23 }
 0x191   : > { %1098 = vmatmul.msk.f32.vlgmr.msrb.gmra.mxu2 %vm446_vm2, %v1200_v24 }
 0x192   : > { %1201 = vpow2.f32 %v555_v26 }
 0x195   : > { %v531_v29 = vpop.permute.xlu2 %530 }
 0x196   : > { %v548_v30 = vsub.f32 %v1568_v34, %v531_v29  ;;  %v506_v33 = vpop.permute.xlu1 %505  ;;  %v571_v29 = vld [vmem:[#allocation3 + $0x20] sm:$0xff] }
 0x197   : > { %v543_v39 = vsub.f32 %v1549_v25, %v506_v33 }
 0x198   : > { %v1202_v35 = vpop.eup %1201  ;;  %v561_v36 = vmul.f32 1.442695, %v548_v30  ;;  %v624_v30 = vld [vmem:[#allocation4] sm:$0xff] }
 0x199   : > { %1096 = vmatmul.msk.f32.vlgmr.msrb.gmra.mxu1 %vm446_vm2, %v1202_v35  ;;  %v589_v28 = vsel %vm446_vm2, %v1202_v35, 0.0  ;;  %v551_v40 = vmul.f32 1.442695, %v543_v39 }
 0x19a   : > { %1203 = vpow2.f32 %v561_v36  ;;  %590 = vadd.xlane.f32.xlu1 %v589_v28 }
 0x19b   : > { %1205 = vpow2.f32 %v551_v40 }
 0x19d   : > { %v511_v27 = vpop.permute.xlu2 %510 }
 0x19e   : > { %v544_v41 = vsub.f32 %v1576_v38, %v511_v27  ;;  %v595_v38 = vsel %vm446_vm2, %v1200_v24, 0.0 }
 0x1a0   : > { %v1204_v42 = vpop.eup %1203  ;;  %v553_v43 = vmul.f32 1.442695, %v544_v41 }
 0x1a1   : > { %1099 = vmatmul.msk.f32.gmra.mxu2 %vm446_vm2, %v1204_v42  ;;  %v598_v34 = vsel %vm446_vm2, %v1204_v42, 0.0  ;;  %v1206_v44 = vpop.eup %1205 }
 0x1a2   : > { %599 = vadd.xlane.f32.xlu1 %v598_v34  ;;  %1094 = vmatmul.msk.f32.vlgmr.msrb.gmra.mxu0 %vm446_vm2, %v1206_v44  ;;  %v583_v25 = vsel %vm446_vm2, %v1206_v44, 0.0  ;;  %1207 = vpow2.f32 %v553_v43  ;;  %v573_v43 = vld [vmem:[#allocation3 + $0x30] sm:$0xff] }
 0x1a3   : > { %584 = vadd.xlane.f32.xlu0 %v583_v25 }
 0x1a5   : > { %v536_v45 = vpop.permute.xlu0 %535  ;;  %v640_v33 = vpop.permute.xlu2 %639 }
 0x1a6   : > { %v549_v47 = vsub.f32 %v1562_v31, %v536_v45  ;;  %v625_v45 = vld [vmem:[#allocation4 + $0x8] sm:$0xff] }
 0x1a8   : > { %v563_v48 = vmul.f32 1.442695, %v549_v47  ;;  %v1208_v50 = vpop.eup %1207 }
 0x1aa   : > { %1209 = vpow2.f32 %v563_v48  ;;  %1095 = vmatmul.msk.f32.gmra.mxu0 %vm446_vm2, %v1208_v50 }
 0x1ab   : > { %596 = vadd.xlane.f32.xlu0 %v595_v38 }
 0x1ad   : > { %v645_v13 = vpop.permute.xlu0 %644 }
 0x1ae   : > { %v541_v52 = vpop.permute.xlu1 %540  ;;  %v674_v15 = vmul.f32 %v645_v13, %v626_v61 }
 0x1af   : > { %v550_v53 = vsub.f32 %v1574_v37, %v541_v52  ;;  %v586_v37 = vsel %vm446_vm2, %v1208_v50, 0.0  ;;  %v673_v52 = vmul.f32 %v640_v33, %v625_v45 }
 0x1b0   : > { %v1210_v56 = vpop.eup %1209 }
 0x1b1   : > { %v565_v58 = vmul.f32 1.442695, %v550_v53  ;;  %1100 = vmatmul.msk.f32.vlgmr.msrb.gmra.mxu3 %vm446_vm2, %v1210_v56  ;;  %v601_v31 = vsel %vm446_vm2, %v1210_v56, 0.0 }
 0x1b2   : > { %602 = vadd.xlane.f32.xlu2 %v601_v31  ;;  %v568_v31 = vld [vmem:[#allocation3 + $0x8] sm:$0xff] }
 0x1b3   : > { %1211 = vpow2.f32 %v565_v58 }
 0x1b4   : > { %1213 = vpow2.f32 %v499_v57 }
 0x1b6   : > { %v521_v59 = vpop.permute.xlu1 %520 }
 0x1b7   : > { %v546_v62 = vsub.f32 %v1564_v32, %v521_v59 }
 0x1b9   : > { %v1212_v1 = vpop.eup %1211  ;;  %v557_v3 = vmul.f32 1.442695, %v546_v62 }
 0x1ba   : > { %v1677_v5 = vpop.eup %1213  ;;  %1101 = vmatmul.msk.f32.gmra.mxu3 %vm446_vm2, %v1212_v1  ;;  %587 = vadd.xlane.f32.xlu2 %v586_v37  ;;  %v604_v54 = vsel %vm446_vm2, %v1212_v1, 0.0 }
 0x1bb   : > { %1215 = vpow2.f32 %v557_v3  ;;  %605 = vadd.xlane.f32.xlu0 %v604_v54  ;;  %664 = vperm.xlu1 %1190, %v1677_v5   ;;  %v581_v47 = vmul.f32 %v1677_v5, %v573_v43  ;;  %v574_v3 = vld [vmem:[#allocation3 + $0x38] sm:$0xff]  ;;  %v576_v54 = vmul.f32 %v1645_v16, %v568_v31 }
 0x1bc   : > { %1217 = vpow2.f32 %v495_v63 }
 0x1bd   : > { %1219 = vpow2.f32 %v501_v6 }
 0x1be   : > { %1221 = vpow2.f32 %v497_v10  ;;  %v635_v46 = vpop.permute.xlu1 %634 }
 0x1bf   : > { %v672_v39 = vmul.f32 %v635_v46, %v624_v30  ;;  %v630_v46 = vld [vmem:[#allocation4 + $0x30] sm:$0xff] }
 0x1c1   : > { %v1216_v60 = vpop.eup %1215 }
 0x1c2   : > { %1097 = vmatmul.msk.f32.gmra.mxu1 %vm446_vm2, %v1216_v60  ;;  %v592_v32 = vsel %vm446_vm2, %v1216_v60, 0.0  ;;  %v1218_v8 = vpop.eup %1217 }
 0x1c3   : > { %593 = vadd.xlane.f32.xlu2 %v592_v32  ;;  %v1693_v11 = vpop.eup %1219  ;;  %v579_v36 = vmul.f32 %v1218_v8, %v571_v29  ;;  %v628_v29 = vld [vmem:[#allocation4 + $0x20] sm:$0xff] }
 0x1c4   : > { %v1222_v12 = vpop.eup %1221  ;;  %v582_v32 = vmul.f32 %v1693_v11, %v574_v3 }
 0x1c5   : > { %v580_v14 = vmul.f32 %v1222_v12, %v572_v55 }
 0x1c6   : > { %v1696_v49 = vpop.permute.xlu1 %649 }
 0x1cf   : > { %654 = vperm.xlu0 %1189, %v1218_v8  }
 0x1d7   : > { %669 = vperm.xlu0 %1189, %v1693_v11  }
 0x1db   : > { %659 = vperm.xlu2 %1188, %v1222_v12  }
 0x20d   : > { %v591_v7 = vpop.xlane.xlu1 %590 }
 0x20e   : > { %v609_v9 = vadd.f32 %v591_v7, %v577_v2  ;;  %v570_v7 = vld [vmem:[#allocation3 + $0x18] sm:$0xff] }
 0x20f   : > { %v578_v11 = vmul.f32 %v1651_v18, %v570_v7 }
 0x210   : > { %618 = vst.msk [vmem:[#allocation3 + $0x10] sm:$0xff] %vm247_vm1, %v609_v9 }
 0x215   : > { %v600_v19 = vpop.xlane.xlu1 %599 }
 0x216   : > { %v612_v20 = vadd.f32 %v600_v19, %v580_v14  ;;  %v732_v21 = vpop.f32.mrf.mxu1  ;;  %v585_v24 = vpop.xlane.xlu0 %584 }
 0x217   : > { %v798_v23 = vadd.f32 %v732_v21, %v674_v15  ;;  %v825_v26 = vld [vmem:[#allocation3 + $0x10] sm:$0xff]  ;;  %v607_v4 = vadd.f32 %v585_v24, %v575_v22  ;;  %v761_v19 = vpop.f32.mrf.mxu2  ;;  %v627_v21 = vld [vmem:[#allocation4 + $0x18] sm:$0xff]  ;;  %v629_v22 = vld [vmem:[#allocation4 + $0x28] sm:$0xff] }
 0x218   : > { %621 = vst.msk [vmem:[#allocation3 + $0x28] sm:$0xff] %vm247_vm1, %v612_v20  ;;  %1223 = vrcp.f32 %v825_v26  ;;  %v675_v24 = vmul.f32 %v1696_v49, %v627_v21 }
 0x219   : > { %806 = vst.msk [vmem:[#allocation4 + $0x10] sm:$0xff] %vm264_vm0, %v798_v23 }
 0x21a   : > { %616 = vst.msk [vmem:[#allocation3] sm:$0xff] %vm247_vm1, %v607_v4 }
 0x21e   : > { %v1224_v35 = vpop.eup %1223  ;;  %v597_v28 = vpop.xlane.xlu0 %596 }
 0x21f   : > { %v841_v40 = vmul.f32 %v1224_v35, %v825_v26  ;;  %v828_v17 = vld [vmem:[#allocation3 + $0x28] sm:$0xff]  ;;  %v611_v27 = vadd.f32 %v597_v28, %v579_v36  ;;  %v703_v41 = vpop.f32.mrf.mxu0 }
 0x220   : > { %1225 = vrcp.f32 %v828_v17  ;;  %v796_v42 = vadd.f32 %v703_v41, %v672_v39 }
 0x221   : > { %v849_v34 = vsub.f32 2.0, %v841_v40  ;;  %v823_v44 = vld [vmem:[#allocation3] sm:$0xff]  ;;  %620 = vst.msk [vmem:[#allocation3 + $0x20] sm:$0xff] %vm247_vm1, %v611_v27 }
 0x222   : > { %1227 = vrcp.f32 %v823_v44  ;;  %804 = vst.msk [vmem:[#allocation4] sm:$0xff] %vm264_vm0, %v796_v42 }
 0x223   : > { %v857_v25 = vmul.f32 %v1224_v35, %v849_v34 }
 0x224   : > { %v764_v35 = vpop.f32.mrf.mxu2 }
 0x225   : > { %v603_v48 = vpop.xlane.xlu2 %602  ;;  %883 = vperm.xlu0 %1189, %v857_v25  }
 0x226   : > { %v1226_v50 = vpop.eup %1225  ;;  %v613_v38 = vadd.f32 %v603_v48, %v581_v47 }
 0x227   : > { %v844_v53 = vmul.f32 %v1226_v50, %v828_v17  ;;  %v706_v57 = vpop.f32.mrf.mxu0 }
 0x228   : > { %v1228_v56 = vpop.eup %1227  ;;  %622 = vst.msk [vmem:[#allocation3 + $0x30] sm:$0xff] %vm247_vm1, %v613_v38  ;;  %v797_v58 = vadd.f32 %v706_v57, %v673_v52  ;;  %v827_v1 = vld [vmem:[#allocation3 + $0x20] sm:$0xff] }
 0x229   : > { %v852_v59 = vsub.f32 2.0, %v844_v53  ;;  %v839_v62 = vmul.f32 %v1228_v56, %v823_v44  ;;  %1229 = vrcp.f32 %v827_v1  ;;  %v631_v44 = vld [vmem:[#allocation4 + $0x38] sm:$0xff] }
 0x22a   : > { %805 = vst.msk [vmem:[#allocation4 + $0x8] sm:$0xff] %vm264_vm0, %v797_v58 }
 0x22b   : > { %v860_v37 = vmul.f32 %v1226_v50, %v852_v59  ;;  %v847_v5 = vsub.f32 2.0, %v839_v62  ;;  %v863_v62 = vld [vmem:[#allocation4] sm:$0xff] }
 0x22d   : > { %v588_v60 = vpop.xlane.xlu2 %587  ;;  %898 = vperm.xlu0 %1189, %v860_v37   ;;  %v855_v63 = vmul.f32 %v1228_v56, %v847_v5  ;;  %v665_v51 = vpop.permute.xlu1 %664  ;;  %v865_v37 = vld [vmem:[#allocation4 + $0x10] sm:$0xff] }
 0x22e   : > { %v608_v6 = vadd.f32 %v588_v60, %v576_v54  ;;  %v606_v8 = vpop.xlane.xlu0 %605  ;;  %v678_v9 = vmul.f32 %v665_v51, %v630_v46 }
 0x22f   : > { %v614_v10 = vadd.f32 %v606_v8, %v582_v32  ;;  %873 = vperm.xlu2 %1188, %v855_v63   ;;  %v1230_v12 = vpop.eup %1229  ;;  %v829_v28 = vld [vmem:[#allocation3 + $0x30] sm:$0xff] }
 0x230   : > { %617 = vst.msk [vmem:[#allocation3 + $0x8] sm:$0xff] %vm247_vm1, %v608_v6  ;;  %v843_v2 = vmul.f32 %v1230_v12, %v827_v1 }
 0x231   : > { %623 = vst.msk [vmem:[#allocation3 + $0x38] sm:$0xff] %vm247_vm1, %v614_v10 }
 0x232   : > { %v851_v16 = vsub.f32 2.0, %v843_v2 }
 0x234   : > { %v790_v13 = vpop.f32.mrf.mxu3  ;;  %v859_v61 = vmul.f32 %v1230_v12, %v851_v16  ;;  %v864_v16 = vld [vmem:[#allocation4 + $0x8] sm:$0xff] }
 0x235   : > { %v802_v55 = vadd.f32 %v790_v13, %v678_v9 }
 0x236   : > { %v594_v0 = vpop.xlane.xlu2 %593  ;;  %893 = vperm.xlu1 %1190, %v859_v61  }
 0x237   : > { %810 = vst.msk [vmem:[#allocation4 + $0x30] sm:$0xff] %vm264_vm0, %v802_v55  ;;  %v610_v14 = vadd.f32 %v594_v0, %v578_v11  ;;  %v824_v15 = vld [vmem:[#allocation3 + $0x8] sm:$0xff] }
 0x238   : > { %1231 = vrcp.f32 %v824_v15  ;;  %v830_v20 = vld [vmem:[#allocation3 + $0x38] sm:$0xff] }
 0x239   : > { %619 = vst.msk [vmem:[#allocation3 + $0x18] sm:$0xff] %vm247_vm1, %v610_v14  ;;  %1233 = vrcp.f32 %v830_v20 }
 0x23d   : > { %v793_v52 = vpop.f32.mrf.mxu3 }
 0x23e   : > { %v1232_v23 = vpop.eup %1231  ;;  %v660_v26 = vpop.permute.xlu2 %659  ;;  %v869_v2 = vld [vmem:[#allocation4 + $0x30] sm:$0xff] }
 0x23f   : > { %v677_v18 = vmul.f32 %v660_v26, %v629_v22  ;;  %v735_v4 = vpop.f32.mrf.mxu1  ;;  %v840_v30 = vmul.f32 %v1232_v23, %v824_v15  ;;  %v1234_v33 = vpop.eup %1233 }
 0x240   : > { %v799_v36 = vadd.f32 %v735_v4, %v675_v24  ;;  %v826_v39 = vld [vmem:[#allocation3 + $0x18] sm:$0xff]  ;;  %v846_v42 = vmul.f32 %v1234_v33, %v830_v20 }
 0x241   : > { %v801_v40 = vadd.f32 %v764_v35, %v677_v18  ;;  %v655_v17 = vpop.permute.xlu0 %654  ;;  %v848_v27 = vsub.f32 2.0, %v840_v30  ;;  %1235 = vrcp.f32 %v826_v39 }
 0x242   : > { %807 = vst.msk [vmem:[#allocation4 + $0x18] sm:$0xff] %vm264_vm0, %v799_v36  ;;  %v676_v41 = vmul.f32 %v655_v17, %v628_v29  ;;  %1237 = vrcp.f32 %v829_v28  ;;  %v854_v25 = vsub.f32 2.0, %v846_v42 }
 0x243   : > { %809 = vst.msk [vmem:[#allocation4 + $0x28] sm:$0xff] %vm264_vm0, %v801_v40  ;;  %v856_v49 = vmul.f32 %v1232_v23, %v848_v27 }
 0x244   : > { %v800_v43 = vadd.f32 %v761_v19, %v676_v41  ;;  %v862_v53 = vmul.f32 %v1234_v33, %v854_v25 }
 0x245   : > { %878 = vperm.xlu1 %1190, %v856_v49  }
 0x246   : > { %808 = vst.msk [vmem:[#allocation4 + $0x20] sm:$0xff] %vm264_vm0, %v800_v43 }
 0x247   : > { %v1236_v34 = vpop.eup %1235 }
 0x248   : > { %v842_v45 = vmul.f32 %v1236_v34, %v826_v39  ;;  %v1238_v47 = vpop.eup %1237 }
 0x249   : > { %v670_v48 = vpop.permute.xlu0 %669  ;;  %v845_v58 = vmul.f32 %v1238_v47, %v829_v28  ;;  %v866_v6 = vld [vmem:[#allocation4 + $0x18] sm:$0xff] }
 0x24a   : > { %v679_v50 = vmul.f32 %v670_v48, %v631_v44  ;;  %v850_v38 = vsub.f32 2.0, %v842_v45  ;;  %v868_v60 = vld [vmem:[#allocation4 + $0x28] sm:$0xff] }
 0x24b   : > { %v853_v31 = vsub.f32 2.0, %v845_v58 }
 0x24c   : > { %v803_v56 = vadd.f32 %v793_v52, %v679_v50  ;;  %v858_v57 = vmul.f32 %v1236_v34, %v850_v38 }
 0x24d   : > { %908 = vperm.xlu1 %1190, %v862_v53   ;;  %v861_v59 = vmul.f32 %v1238_v47, %v853_v31  ;;  %v867_v12 = vld [vmem:[#allocation4 + $0x20] sm:$0xff] }
 0x24e   : > { %811 = vst.msk [vmem:[#allocation4 + $0x38] sm:$0xff] %vm264_vm0, %v803_v56  ;;  %888 = vperm.xlu2 %1188, %v858_v57  }
 0x255   : > { %v870_v11 = vld [vmem:[#allocation4 + $0x38] sm:$0xff] }
 0x256   : > { %903 = vperm.xlu2 %1188, %v861_v59  }
 0x289   : > { %v874_v1 = vpop.permute.xlu2 %873 }
 0x28a   : > { %v911_v3 = vmul.f32 %v874_v1, %v863_v62 }
 0x28c   : > { %919 = vst.msk [vmem:[%s1722_s21] sm:$0xff] %vm264_vm0, %v911_v3 }
 0x297   : > { %v884_v5 = vpop.permute.xlu0 %883 }
 0x298   : > { %v913_v54 = vmul.f32 %v884_v5, %v865_v37 }
 0x29a   : > { %921 = vst.msk [vmem:[%s1722_s21 + $0x10] sm:$0xff] %vm264_vm0, %v913_v54 }
 0x29f   : > { %v899_v32 = vpop.permute.xlu0 %898 }
 0x2a0   : > { %v916_v63 = vmul.f32 %v899_v32, %v868_v60 }
 0x2a2   : > { %924 = vst.msk [vmem:[%s1722_s21 + $0x28] sm:$0xff] %vm264_vm0, %v916_v63 }
 0x2a8   : > { %v889_v8 = vpop.permute.xlu2 %888  ;;  %v894_v46 = vpop.permute.xlu1 %893 }
 0x2a9   : > { %v914_v10 = vmul.f32 %v889_v8, %v866_v6  ;;  %v915_v51 = vmul.f32 %v894_v46, %v867_v12 }
 0x2ab   : > { %922 = vst.msk [vmem:[%s1722_s21 + $0x18] sm:$0xff] %vm264_vm0, %v914_v10 }
 0x2ac   : > { %923 = vst.msk [vmem:[%s1722_s21 + $0x20] sm:$0xff] %vm264_vm0, %v915_v51 }
 0x2b0   : > { %v904_v7 = vpop.permute.xlu2 %903 }
 0x2b1   : > { %v917_v9 = vmul.f32 %v904_v7, %v869_v2 }
 0x2b3   : > { %925 = vst.msk [vmem:[%s1722_s21 + $0x30] sm:$0xff] %vm264_vm0, %v917_v9 }
 0x2b7   : > { %v879_v13 = vpop.permute.xlu1 %878 }
 0x2b8   : > { %v912_v55 = vmul.f32 %v879_v13, %v864_v16 }
 0x2ba   : > { %920 = vst.msk [vmem:[%s1722_s21 + $0x8] sm:$0xff] %vm264_vm0, %v912_v55 }
 0x2bf   : > { %v909_v61 = vpop.permute.xlu1 %908 }
 0x2c0   : > { %v918_v0 = vmul.f32 %v909_v61, %v870_v11 }
 0x2c2   : > { %926 = vst.msk [vmem:[%s1722_s21 + $0x38] sm:$0xff] %vm264_vm0, %v918_v0 }
 0x2c3   : > { %1326 = shalt.err (!%p1323_p13)
}
 0x2c4   : > { %s1392_s3 = smov 128   ;;  %s1393_s5 = smov 8  }
 0x2c5   : > { %1118 = dma.vmem_to_hbm [thread:$0]  (%p1460_p9), %s944_s16, 1024, %s946_s18, %s928_s12, %s1392_s3, %s1392_s3, %s1393_s5  }
 0x2c6 PF: > { %s960_s25 = sand.u32 1, %s1365_s9   ;;  %p1128_p0 = pnand %p1065_p12, %p1467_p11 }
 0x2c7   : > { %s961_s26 = scalar_lea.sflag [#allocation7], %s960_s25 }
 0x2c8   : > { %p1129_p1 = pneg %p1128_p0 }
 0x2ca   : > { %1360 = dma.done.wait (%p1129_p1), %s961_s26, 1024  }
 0x2cb   : > { %1362 = vsyncadd (%p1129_p1), %s961_s26, 4294966272  ;;  %s21_s14 = sadd.s32 1, %s1385_s14   ;;  %s1787_s9 = smov %s1369_s10 }
 0x2cc   : > { %p18_p2 = scmp.ge.s32.totalorder %s21_s14, 4   ;;  %s1788_s10 = smov %s1373_s11 }
 0x2cd   : > { %s1789_s11 = smov %s1465_s23  ;;  %s1790_s12 = smov %s1381_s13 }
 0x2ce   : > { %s1791_s13 = smov %s1793_s17  ;;  %20 = sbr.rel (!%p18_p2) target bundleno = 8 (0x8), region = 94 }
 0x2d3   :  { %967 = vsyncpa [#allocation6], 1 }
 0x2d4   :  { %969 = vsyncpa [#allocation6 + $0x1], 1 }
 0x2d5   :  { %970 = vsyncpa [#allocation9], 1 }
 0x2d6   :  { %972 = vsyncpa [#allocation9 + $0x1], 1 }
 0x2d7   :  { %973 = vsyncpa [#allocation7], 1 }
 0x2d8   :  { %975 = vsyncpa [#allocation7 + $0x1], 1 }

</bundles_post_ra>
